<compile_context>
chip_gen: v6e
topology: v6e:2x2x1
jax: 0.10.0
libtpu: 0.0.40
codegen_flags: <defaults>
</compile_context>

<pallas_src>
import functools

import jax
import jax.numpy as jnp
from jax.experimental import pallas as pl
from jax.experimental.pallas import tpu as pltpu

PENALTY_COEF = 10.0
LRELU_SLOPE = 0.2


def _gp_penalty_kernel(coef_ref, w_ref, b_ref, rimg_ref, fimg_ref,
                       out_ref, acc_ref, *, n_feat, n_chan, sub_rows, slope):
    """Accumulate sum over pixels of (||d critic / d x||_channels - 1)^2.

    rimg_ref/fimg_ref: (1, C, block_rows, 128) VMEM tiles (lane-dense pixels).
    coef_ref: (B,) SMEM; w_ref: (F, C) SMEM; b_ref: (F,) SMEM.
    out_ref: (1, 1, 1) per-batch partial sum.
    acc_ref: (acc_rows, 128) VMEM vector accumulator (reduced once at flush).
    """
    b_idx = pl.program_id(0)
    p_idx = pl.program_id(1)

    @pl.when(p_idx == 0)
    def _init():
        acc_ref[...] = jnp.zeros_like(acc_ref)

    coef = coef_ref[b_idx]                                  # per-batch mix scalar
    # Hoist the tiny critic parameters out of the unrolled pixel loop.
    wv = [[w_ref[fi, ci] for ci in range(n_chan)] for fi in range(n_feat)]
    bv = [b_ref[fi] for fi in range(n_feat)]

    block_rows = rimg_ref.shape[2]
    n_sub = block_rows // sub_rows

    for s in range(n_sub):                                  # static unroll
        r0 = s * sub_rows
        # penalty_input = coef*real + (1-coef)*fake, one (sub_rows,128) slab
        # per channel (full sublane/lane density on the VPU).
        x = []
        for ci in range(n_chan):
            rc = rimg_ref[0, ci, r0:r0 + sub_rows, :]
            fc = fimg_ref[0, ci, r0:r0 + sub_rows, :]
            x.append(fc + coef * (rc - fc))

        # Analytic input-gradient of sum(LeakyReLU(x @ W^T + b)):
        #   grad[c] = sum_f lrelu'(z_f) * w[f, c]
        gacc = [None] * n_chan
        for fi in range(n_feat):
            z = x[0] * wv[fi][0]
            for ci in range(1, n_chan):
                z = z + x[ci] * wv[fi][ci]
            z = z + bv[fi]
            m = jnp.where(z > 0.0, 1.0, slope)              # LeakyReLU'(z)
            for ci in range(n_chan):
                t = m * wv[fi][ci]
                gacc[ci] = t if gacc[ci] is None else gacc[ci] + t

        gsq = gacc[0] * gacc[0]
        for ci in range(1, n_chan):
            gsq = gsq + gacc[ci] * gacc[ci]
        nrm = jnp.sqrt(gsq)                                 # per-pixel channel L2
        err = jnp.square(nrm - 1.0)
        # Elementwise vector accumulation; no in-loop cross-lane reduce.
        acc_ref[0:sub_rows, :] = acc_ref[0:sub_rows, :] + err

    @pl.when(p_idx == pl.num_programs(1) - 1)
    def _finalize():
        out_ref[...] = jnp.full(out_ref.shape, jnp.sum(acc_ref[...]),
                                dtype=out_ref.dtype)


def wasserstein_gp(real, fake, real_img, fake_img, coef, w, b,
                   penalty_coef=PENALTY_COEF):
    """real/fake: (B,1) critic scores; real_img/fake_img: (B,C,H,W); coef: (B,)."""
    B, C, H, W = real_img.shape
    HW = H * W
    F_out = w.shape[0]
    if HW % 128 != 0:
        # TODO(synk): pad-and-mask path for spatial sizes not divisible by 128.
        raise NotImplementedError("H*W must be a multiple of 128")
    n_rows = HW // 128

    # Free reshape (no transpose, no extra HBM pass): pixels -> (rows, 128).
    rimg = real_img.reshape(B, C, n_rows, 128).astype(jnp.float32)
    fimg = fake_img.reshape(B, C, n_rows, 128).astype(jnp.float32)

    # Pixel tile: biggest candidate that divides evenly; else the full extent.
    block_rows = n_rows
    for cand in (256, 128, 64, 32, 16, 8):
        if n_rows % cand == 0:
            block_rows = cand
            break
    n_pix_blocks = n_rows // block_rows
    if block_rows % 16 == 0:
        sub_rows = 16          # 2048 px per unrolled step: ~25 live vregs
    elif block_rows % 8 == 0:
        sub_rows = 8
    else:
        sub_rows = block_rows
    acc_rows = max(sub_rows, 8)   # keep the accumulator at least one full tile

    kernel = functools.partial(_gp_penalty_kernel, n_feat=F_out, n_chan=C,
                               sub_rows=sub_rows, slope=LRELU_SLOPE)

    img_spec = pl.BlockSpec((1, C, block_rows, 128),
                            lambda bi, pi: (bi, 0, pi, 0))
    smem_spec = pl.BlockSpec(memory_space=pltpu.MemorySpace.SMEM)

    partial_sums = pl.pallas_call(
        kernel,
        out_shape=jax.ShapeDtypeStruct((B, 1, 1), jnp.float32),
        grid=(B, n_pix_blocks),
        in_specs=[smem_spec, smem_spec, smem_spec, img_spec, img_spec],
        out_specs=pl.BlockSpec((1, 1, 1), lambda bi, pi: (bi, 0, 0)),
        scratch_shapes=[pltpu.VMEM((acc_rows, 128), jnp.float32)],
        compiler_params=pltpu.CompilerParams(
            dimension_semantics=("parallel", "arbitrary"),
            vmem_limit_bytes=32 * 1024 * 1024),
    )(coef.reshape(B).astype(jnp.float32),
      w.astype(jnp.float32),
      b.reshape(F_out).astype(jnp.float32),
      rimg, fimg)

    penalty_mean = jnp.sum(partial_sums) / (B * HW)
    # Tiny (B,1) score means stay outside the hot kernel.
    return jnp.mean(fake) - jnp.mean(real) + penalty_coef * penalty_mean


def _reference(real, fake, real_img, fake_img, coef, w, b,
               penalty_coef=PENALTY_COEF):
    """Pure-JAX reference matching the PyTorch module with the synthetic critic."""
    B = real_img.shape[0]
    c = coef.reshape(B, 1, 1, 1)
    x = c * real_img + (1.0 - c) * fake_img
    z = jnp.einsum("fc,bchw->bfhw", w, x) + b.reshape(1, -1, 1, 1)
    mask = jnp.where(z > 0.0, 1.0, LRELU_SLOPE)
    grad = jnp.einsum("bfhw,fc->bchw", mask, w)
    nrm = jnp.sqrt(jnp.sum(grad * grad, axis=1))
    penalty = jnp.mean(jnp.square(nrm - 1.0))
    return jnp.mean(fake) - jnp.mean(real) + penalty_coef * penalty


if __name__ == "__main__":
    key = jax.random.PRNGKey(0)
    k_real, k_fake, k_rimg, k_fimg, k_coef, k_w = jax.random.split(key, 6)

    B, C, H, W = 2, 4, 16, 16
    F_OUT = 8

    real = jax.random.normal(k_real, (B, 1), dtype=jnp.float32)
    fake = jax.random.normal(k_fake, (B, 1), dtype=jnp.float32)
    real_img = jax.random.normal(k_rimg, (B, C, H, W), dtype=jnp.float32)
    fake_img = jax.random.normal(k_fimg, (B, C, H, W), dtype=jnp.float32)

    # torch used np.random.uniform per forward; here deterministic via PRNGKey.
    coef = jax.random.uniform(k_coef, (B,), dtype=jnp.float32)

    # deterministic synthetic critic parameters (1x1 conv C -> F_OUT)
    w = 0.1 * jax.random.normal(k_w, (F_OUT, C), dtype=jnp.float32)
    b = jnp.zeros((F_OUT,), dtype=jnp.float32)

    out = wasserstein_gp(real, fake, real_img, fake_img, coef, w, b)
    out = jax.block_until_ready(out)
    ref = _reference(real, fake, real_img, fake_img, coef, w, b)
    assert jnp.isfinite(out)
    assert jnp.allclose(out, ref, rtol=1e-4, atol=1e-4), (out, ref)
    print("KERNEL_OK")
</pallas_src>

<mosaic_0001>
module attributes {stable_mosaic.version = 11 : i64} {
  func.func @_gp_penalty_kernel(%arg0: i32, %arg1: i32, %arg2: memref<2xf32, #tpu.memory_space<smem>>, %arg3: memref<8x4xf32, #tpu.memory_space<smem>>, %arg4: memref<8xf32, #tpu.memory_space<smem>>, %arg5: memref<1x4x2x128xf32, #tpu.memory_space<vmem>>, %arg6: memref<1x4x2x128xf32, #tpu.memory_space<vmem>>, %arg7: memref<1x1x1xf32, #tpu.memory_space<vmem>>, %arg8: memref<8x128xf32, #tpu.memory_space<vmem>>) attributes {dimension_semantics = [#tpu.dimension_semantics<parallel>, #tpu.dimension_semantics<arbitrary>], iteration_bounds = array<i64: 2, 1>, scalar_prefetch = 0 : i64, scratch_operands = 1 : i64, tpu.core_type = #tpu.core_type<tc>, window_params = [{transform_indices = @transform_0, window_bounds = array<i64: 2>}, {transform_indices = @transform_1, window_bounds = array<i64: 8, 4>}, {transform_indices = @transform_2, window_bounds = array<i64: 8>}, {transform_indices = @transform_3, window_bounds = array<i64: 1, 4, 2, 128>}, {transform_indices = @transform_4, window_bounds = array<i64: 1, 4, 2, 128>}, {transform_indices = @transform_5, window_bounds = array<i64: 1, 1, 1>}]} {
    %c0_i32 = arith.constant 0 : i32
    %0 = arith.cmpi eq, %arg1, %c0_i32 : i32
    %1 = arith.extui %0 : i1 to i32
    %c0_i32_0 = arith.constant 0 : i32
    %2 = arith.cmpi ne, %1, %c0_i32_0 : i32
    scf.if %2 {
      %cst_127 = arith.constant 0.000000e+00 : f32
      %330 = vector.broadcast %cst_127 : f32 to vector<8x128xf32>
      %c0_128 = arith.constant 0 : index
      %c0_129 = arith.constant 0 : index
      %331 = vector.load %arg8[%c0_128, %c0_129] : memref<8x128xf32, #tpu.memory_space<vmem>>, vector<8x128xf32>
      tpu.vector_store %arg8[%c0_128, %c0_129], %330 {strides = array<i32>} : memref<8x128xf32, #tpu.memory_space<vmem>>, vector<8x128xf32>,
    } else {
    }
    %3 = arith.index_cast %arg0 : i32 to index
    %4 = memref.load %arg2[%3] : memref<2xf32, #tpu.memory_space<smem>>
    %c0 = arith.constant 0 : index
    %c0_1 = arith.constant 0 : index
    %5 = memref.load %arg3[%c0, %c0_1] : memref<8x4xf32, #tpu.memory_space<smem>>
    %c0_2 = arith.constant 0 : index
    %c1 = arith.constant 1 : index
    %6 = memref.load %arg3[%c0_2, %c1] : memref<8x4xf32, #tpu.memory_space<smem>>
    %c0_3 = arith.constant 0 : index
    %c2 = arith.constant 2 : index
    %7 = memref.load %arg3[%c0_3, %c2] : memref<8x4xf32, #tpu.memory_space<smem>>
    %c0_4 = arith.constant 0 : index
    %c3 = arith.constant 3 : index
    %8 = memref.load %arg3[%c0_4, %c3] : memref<8x4xf32, #tpu.memory_space<smem>>
    %c1_5 = arith.constant 1 : index
    %c0_6 = arith.constant 0 : index
    %9 = memref.load %arg3[%c1_5, %c0_6] : memref<8x4xf32, #tpu.memory_space<smem>>
    %c1_7 = arith.constant 1 : index
    %c1_8 = arith.constant 1 : index
    %10 = memref.load %arg3[%c1_7, %c1_8] : memref<8x4xf32, #tpu.memory_space<smem>>
    %c1_9 = arith.constant 1 : index
    %c2_10 = arith.constant 2 : index
    %11 = memref.load %arg3[%c1_9, %c2_10] : memref<8x4xf32, #tpu.memory_space<smem>>
    %c1_11 = arith.constant 1 : index
    %c3_12 = arith.constant 3 : index
    %12 = memref.load %arg3[%c1_11, %c3_12] : memref<8x4xf32, #tpu.memory_space<smem>>
    %c2_13 = arith.constant 2 : index
    %c0_14 = arith.constant 0 : index
    %13 = memref.load %arg3[%c2_13, %c0_14] : memref<8x4xf32, #tpu.memory_space<smem>>
    %c2_15 = arith.constant 2 : index
    %c1_16 = arith.constant 1 : index
    %14 = memref.load %arg3[%c2_15, %c1_16] : memref<8x4xf32, #tpu.memory_space<smem>>
    %c2_17 = arith.constant 2 : index
    %c2_18 = arith.constant 2 : index
    %15 = memref.load %arg3[%c2_17, %c2_18] : memref<8x4xf32, #tpu.memory_space<smem>>
    %c2_19 = arith.constant 2 : index
    %c3_20 = arith.constant 3 : index
    %16 = memref.load %arg3[%c2_19, %c3_20] : memref<8x4xf32, #tpu.memory_space<smem>>
    %c3_21 = arith.constant 3 : index
    %c0_22 = arith.constant 0 : index
    %17 = memref.load %arg3[%c3_21, %c0_22] : memref<8x4xf32, #tpu.memory_space<smem>>
    %c3_23 = arith.constant 3 : index
    %c1_24 = arith.constant 1 : index
    %18 = memref.load %arg3[%c3_23, %c1_24] : memref<8x4xf32, #tpu.memory_space<smem>>
    %c3_25 = arith.constant 3 : index
    %c2_26 = arith.constant 2 : index
    %19 = memref.load %arg3[%c3_25, %c2_26] : memref<8x4xf32, #tpu.memory_space<smem>>
    %c3_27 = arith.constant 3 : index
    %c3_28 = arith.constant 3 : index
    %20 = memref.load %arg3[%c3_27, %c3_28] : memref<8x4xf32, #tpu.memory_space<smem>>
    %c4 = arith.constant 4 : index
    %c0_29 = arith.constant 0 : index
    %21 = memref.load %arg3[%c4, %c0_29] : memref<8x4xf32, #tpu.memory_space<smem>>
    %c4_30 = arith.constant 4 : index
    %c1_31 = arith.constant 1 : index
    %22 = memref.load %arg3[%c4_30, %c1_31] : memref<8x4xf32, #tpu.memory_space<smem>>
    %c4_32 = arith.constant 4 : index
    %c2_33 = arith.constant 2 : index
    %23 = memref.load %arg3[%c4_32, %c2_33] : memref<8x4xf32, #tpu.memory_space<smem>>
    %c4_34 = arith.constant 4 : index
    %c3_35 = arith.constant 3 : index
    %24 = memref.load %arg3[%c4_34, %c3_35] : memref<8x4xf32, #tpu.memory_space<smem>>
    %c5 = arith.constant 5 : index
    %c0_36 = arith.constant 0 : index
    %25 = memref.load %arg3[%c5, %c0_36] : memref<8x4xf32, #tpu.memory_space<smem>>
    %c5_37 = arith.constant 5 : index
    %c1_38 = arith.constant 1 : index
    %26 = memref.load %arg3[%c5_37, %c1_38] : memref<8x4xf32, #tpu.memory_space<smem>>
    %c5_39 = arith.constant 5 : index
    %c2_40 = arith.constant 2 : index
    %27 = memref.load %arg3[%c5_39, %c2_40] : memref<8x4xf32, #tpu.memory_space<smem>>
    %c5_41 = arith.constant 5 : index
    %c3_42 = arith.constant 3 : index
    %28 = memref.load %arg3[%c5_41, %c3_42] : memref<8x4xf32, #tpu.memory_space<smem>>
    %c6 = arith.constant 6 : index
    %c0_43 = arith.constant 0 : index
    %29 = memref.load %arg3[%c6, %c0_43] : memref<8x4xf32, #tpu.memory_space<smem>>
    %c6_44 = arith.constant 6 : index
    %c1_45 = arith.constant 1 : index
    %30 = memref.load %arg3[%c6_44, %c1_45] : memref<8x4xf32, #tpu.memory_space<smem>>
    %c6_46 = arith.constant 6 : index
    %c2_47 = arith.constant 2 : index
    %31 = memref.load %arg3[%c6_46, %c2_47] : memref<8x4xf32, #tpu.memory_space<smem>>
    %c6_48 = arith.constant 6 : index
    %c3_49 = arith.constant 3 : index
    %32 = memref.load %arg3[%c6_48, %c3_49] : memref<8x4xf32, #tpu.memory_space<smem>>
    %c7 = arith.constant 7 : index
    %c0_50 = arith.constant 0 : index
    %33 = memref.load %arg3[%c7, %c0_50] : memref<8x4xf32, #tpu.memory_space<smem>>
    %c7_51 = arith.constant 7 : index
    %c1_52 = arith.constant 1 : index
    %34 = memref.load %arg3[%c7_51, %c1_52] : memref<8x4xf32, #tpu.memory_space<smem>>
    %c7_53 = arith.constant 7 : index
    %c2_54 = arith.constant 2 : index
    %35 = memref.load %arg3[%c7_53, %c2_54] : memref<8x4xf32, #tpu.memory_space<smem>>
    %c7_55 = arith.constant 7 : index
    %c3_56 = arith.constant 3 : index
    %36 = memref.load %arg3[%c7_55, %c3_56] : memref<8x4xf32, #tpu.memory_space<smem>>
    %c0_57 = arith.constant 0 : index
    %37 = memref.load %arg4[%c0_57] : memref<8xf32, #tpu.memory_space<smem>>
    %c1_58 = arith.constant 1 : index
    %38 = memref.load %arg4[%c1_58] : memref<8xf32, #tpu.memory_space<smem>>
    %c2_59 = arith.constant 2 : index
    %39 = memref.load %arg4[%c2_59] : memref<8xf32, #tpu.memory_space<smem>>
    %c3_60 = arith.constant 3 : index
    %40 = memref.load %arg4[%c3_60] : memref<8xf32, #tpu.memory_space<smem>>
    %c4_61 = arith.constant 4 : index
    %41 = memref.load %arg4[%c4_61] : memref<8xf32, #tpu.memory_space<smem>>
    %c5_62 = arith.constant 5 : index
    %42 = memref.load %arg4[%c5_62] : memref<8xf32, #tpu.memory_space<smem>>
    %c6_63 = arith.constant 6 : index
    %43 = memref.load %arg4[%c6_63] : memref<8xf32, #tpu.memory_space<smem>>
    %c7_64 = arith.constant 7 : index
    %44 = memref.load %arg4[%c7_64] : memref<8xf32, #tpu.memory_space<smem>>
    %c0_65 = arith.constant 0 : index
    %c0_66 = arith.constant 0 : index
    %c0_67 = arith.constant 0 : index
    %c0_68 = arith.constant 0 : index
    %45 = vector.load %arg5[%c0_65, %c0_66, %c0_67, %c0_68] : memref<1x4x2x128xf32, #tpu.memory_space<vmem>>, vector<1x1x2x128xf32>
    %46 = vector.shape_cast %45 : vector<1x1x2x128xf32> to vector<2x128xf32>
    %c0_69 = arith.constant 0 : index
    %c0_70 = arith.constant 0 : index
    %c0_71 = arith.constant 0 : index
    %c0_72 = arith.constant 0 : index
    %47 = vector.load %arg6[%c0_69, %c0_70, %c0_71, %c0_72] : memref<1x4x2x128xf32, #tpu.memory_space<vmem>>, vector<1x1x2x128xf32>
    %48 = vector.shape_cast %47 : vector<1x1x2x128xf32> to vector<2x128xf32>
    %49 = arith.subf %46, %48 : vector<2x128xf32>
    %50 = vector.broadcast %4 : f32 to vector<2x128xf32>
    %51 = arith.mulf %50, %49 : vector<2x128xf32>
    %52 = arith.addf %48, %51 : vector<2x128xf32>
    %c0_73 = arith.constant 0 : index
    %c1_74 = arith.constant 1 : index
    %c0_75 = arith.constant 0 : index
    %c0_76 = arith.constant 0 : index
    %53 = vector.load %arg5[%c0_73, %c1_74, %c0_75, %c0_76] : memref<1x4x2x128xf32, #tpu.memory_space<vmem>>, vector<1x1x2x128xf32>
    %54 = vector.shape_cast %53 : vector<1x1x2x128xf32> to vector<2x128xf32>
    %c0_77 = arith.constant 0 : index
    %c1_78 = arith.constant 1 : index
    %c0_79 = arith.constant 0 : index
    %c0_80 = arith.constant 0 : index
    %55 = vector.load %arg6[%c0_77, %c1_78, %c0_79, %c0_80] : memref<1x4x2x128xf32, #tpu.memory_space<vmem>>, vector<1x1x2x128xf32>
    %56 = vector.shape_cast %55 : vector<1x1x2x128xf32> to vector<2x128xf32>
    %57 = arith.subf %54, %56 : vector<2x128xf32>
    %58 = vector.broadcast %4 : f32 to vector<2x128xf32>
    %59 = arith.mulf %58, %57 : vector<2x128xf32>
    %60 = arith.addf %56, %59 : vector<2x128xf32>
    %c0_81 = arith.constant 0 : index
    %c2_82 = arith.constant 2 : index
    %c0_83 = arith.constant 0 : index
    %c0_84 = arith.constant 0 : index
    %61 = vector.load %arg5[%c0_81, %c2_82, %c0_83, %c0_84] : memref<1x4x2x128xf32, #tpu.memory_space<vmem>>, vector<1x1x2x128xf32>
    %62 = vector.shape_cast %61 : vector<1x1x2x128xf32> to vector<2x128xf32>
    %c0_85 = arith.constant 0 : index
    %c2_86 = arith.constant 2 : index
    %c0_87 = arith.constant 0 : index
    %c0_88 = arith.constant 0 : index
    %63 = vector.load %arg6[%c0_85, %c2_86, %c0_87, %c0_88] : memref<1x4x2x128xf32, #tpu.memory_space<vmem>>, vector<1x1x2x128xf32>
    %64 = vector.shape_cast %63 : vector<1x1x2x128xf32> to vector<2x128xf32>
    %65 = arith.subf %62, %64 : vector<2x128xf32>
    %66 = vector.broadcast %4 : f32 to vector<2x128xf32>
    %67 = arith.mulf %66, %65 : vector<2x128xf32>
    %68 = arith.addf %64, %67 : vector<2x128xf32>
    %c0_89 = arith.constant 0 : index
    %c3_90 = arith.constant 3 : index
    %c0_91 = arith.constant 0 : index
    %c0_92 = arith.constant 0 : index
    %69 = vector.load %arg5[%c0_89, %c3_90, %c0_91, %c0_92] : memref<1x4x2x128xf32, #tpu.memory_space<vmem>>, vector<1x1x2x128xf32>
    %70 = vector.shape_cast %69 : vector<1x1x2x128xf32> to vector<2x128xf32>
    %c0_93 = arith.constant 0 : index
    %c3_94 = arith.constant 3 : index
    %c0_95 = arith.constant 0 : index
    %c0_96 = arith.constant 0 : index
    %71 = vector.load %arg6[%c0_93, %c3_94, %c0_95, %c0_96] : memref<1x4x2x128xf32, #tpu.memory_space<vmem>>, vector<1x1x2x128xf32>
    %72 = vector.shape_cast %71 : vector<1x1x2x128xf32> to vector<2x128xf32>
    %73 = arith.subf %70, %72 : vector<2x128xf32>
    %74 = vector.broadcast %4 : f32 to vector<2x128xf32>
    %75 = arith.mulf %74, %73 : vector<2x128xf32>
    %76 = arith.addf %72, %75 : vector<2x128xf32>
    %77 = vector.broadcast %5 : f32 to vector<2x128xf32>
    %78 = arith.mulf %52, %77 : vector<2x128xf32>
    %79 = vector.broadcast %6 : f32 to vector<2x128xf32>
    %80 = arith.mulf %60, %79 : vector<2x128xf32>
    %81 = arith.addf %78, %80 : vector<2x128xf32>
    %82 = vector.broadcast %7 : f32 to vector<2x128xf32>
    %83 = arith.mulf %68, %82 : vector<2x128xf32>
    %84 = arith.addf %81, %83 : vector<2x128xf32>
    %85 = vector.broadcast %8 : f32 to vector<2x128xf32>
    %86 = arith.mulf %76, %85 : vector<2x128xf32>
    %87 = arith.addf %84, %86 : vector<2x128xf32>
    %88 = vector.broadcast %37 : f32 to vector<2x128xf32>
    %89 = arith.addf %87, %88 : vector<2x128xf32>
    %cst = arith.constant 0.000000e+00 : f32
    %90 = vector.broadcast %cst : f32 to vector<2x128xf32>
    %91 = arith.cmpf ogt, %89, %90 : vector<2x128xf32>
    %cst_97 = arith.constant 1.000000e+00 : f32
    %cst_98 = arith.constant 2.000000e-01 : f32
    %92 = vector.broadcast %cst_97 : f32 to vector<2x128xf32>
    %93 = vector.broadcast %cst_98 : f32 to vector<2x128xf32>
    %94 = arith.select %91, %92, %93 : vector<2x128xi1>, vector<2x128xf32>
    %95 = vector.broadcast %5 : f32 to vector<2x128xf32>
    %96 = arith.mulf %94, %95 : vector<2x128xf32>
    %97 = vector.broadcast %6 : f32 to vector<2x128xf32>
    %98 = arith.mulf %94, %97 : vector<2x128xf32>
    %99 = vector.broadcast %7 : f32 to vector<2x128xf32>
    %100 = arith.mulf %94, %99 : vector<2x128xf32>
    %101 = vector.broadcast %8 : f32 to vector<2x128xf32>
    %102 = arith.mulf %94, %101 : vector<2x128xf32>
    %103 = vector.broadcast %9 : f32 to vector<2x128xf32>
    %104 = arith.mulf %52, %103 : vector<2x128xf32>
    %105 = vector.broadcast %10 : f32 to vector<2x128xf32>
    %106 = arith.mulf %60, %105 : vector<2x128xf32>
    %107 = arith.addf %104, %106 : vector<2x128xf32>
    %108 = vector.broadcast %11 : f32 to vector<2x128xf32>
    %109 = arith.mulf %68, %108 : vector<2x128xf32>
    %110 = arith.addf %107, %109 : vector<2x128xf32>
    %111 = vector.broadcast %12 : f32 to vector<2x128xf32>
    %112 = arith.mulf %76, %111 : vector<2x128xf32>
    %113 = arith.addf %110, %112 : vector<2x128xf32>
    %114 = vector.broadcast %38 : f32 to vector<2x128xf32>
    %115 = arith.addf %113, %114 : vector<2x128xf32>
    %cst_99 = arith.constant 0.000000e+00 : f32
    %116 = vector.broadcast %cst_99 : f32 to vector<2x128xf32>
    %117 = arith.cmpf ogt, %115, %116 : vector<2x128xf32>
    %cst_100 = arith.constant 1.000000e+00 : f32
    %cst_101 = arith.constant 2.000000e-01 : f32
    %118 = vector.broadcast %cst_100 : f32 to vector<2x128xf32>
    %119 = vector.broadcast %cst_101 : f32 to vector<2x128xf32>
    %120 = arith.select %117, %118, %119 : vector<2x128xi1>, vector<2x128xf32>
    %121 = vector.broadcast %9 : f32 to vector<2x128xf32>
    %122 = arith.mulf %120, %121 : vector<2x128xf32>
    %123 = arith.addf %96, %122 : vector<2x128xf32>
    %124 = vector.broadcast %10 : f32 to vector<2x128xf32>
    %125 = arith.mulf %120, %124 : vector<2x128xf32>
    %126 = arith.addf %98, %125 : vector<2x128xf32>
    %127 = vector.broadcast %11 : f32 to vector<2x128xf32>
    %128 = arith.mulf %120, %127 : vector<2x128xf32>
    %129 = arith.addf %100, %128 : vector<2x128xf32>
    %130 = vector.broadcast %12 : f32 to vector<2x128xf32>
    %131 = arith.mulf %120, %130 : vector<2x128xf32>
    %132 = arith.addf %102, %131 : vector<2x128xf32>
    %133 = vector.broadcast %13 : f32 to vector<2x128xf32>
    %134 = arith.mulf %52, %133 : vector<2x128xf32>
    %135 = vector.broadcast %14 : f32 to vector<2x128xf32>
    %136 = arith.mulf %60, %135 : vector<2x128xf32>
    %137 = arith.addf %134, %136 : vector<2x128xf32>
    %138 = vector.broadcast %15 : f32 to vector<2x128xf32>
    %139 = arith.mulf %68, %138 : vector<2x128xf32>
    %140 = arith.addf %137, %139 : vector<2x128xf32>
    %141 = vector.broadcast %16 : f32 to vector<2x128xf32>
    %142 = arith.mulf %76, %141 : vector<2x128xf32>
    %143 = arith.addf %140, %142 : vector<2x128xf32>
    %144 = vector.broadcast %39 : f32 to vector<2x128xf32>
    %145 = arith.addf %143, %144 : vector<2x128xf32>
    %cst_102 = arith.constant 0.000000e+00 : f32
    %146 = vector.broadcast %cst_102 : f32 to vector<2x128xf32>
    %147 = arith.cmpf ogt, %145, %146 : vector<2x128xf32>
    %cst_103 = arith.constant 1.000000e+00 : f32
    %cst_104 = arith.constant 2.000000e-01 : f32
    %148 = vector.broadcast %cst_103 : f32 to vector<2x128xf32>
    %149 = vector.broadcast %cst_104 : f32 to vector<2x128xf32>
    %150 = arith.select %147, %148, %149 : vector<2x128xi1>, vector<2x128xf32>
    %151 = vector.broadcast %13 : f32 to vector<2x128xf32>
    %152 = arith.mulf %150, %151 : vector<2x128xf32>
    %153 = arith.addf %123, %152 : vector<2x128xf32>
    %154 = vector.broadcast %14 : f32 to vector<2x128xf32>
    %155 = arith.mulf %150, %154 : vector<2x128xf32>
    %156 = arith.addf %126, %155 : vector<2x128xf32>
    %157 = vector.broadcast %15 : f32 to vector<2x128xf32>
    %158 = arith.mulf %150, %157 : vector<2x128xf32>
    %159 = arith.addf %129, %158 : vector<2x128xf32>
    %160 = vector.broadcast %16 : f32 to vector<2x128xf32>
    %161 = arith.mulf %150, %160 : vector<2x128xf32>
    %162 = arith.addf %132, %161 : vector<2x128xf32>
    %163 = vector.broadcast %17 : f32 to vector<2x128xf32>
    %164 = arith.mulf %52, %163 : vector<2x128xf32>
    %165 = vector.broadcast %18 : f32 to vector<2x128xf32>
    %166 = arith.mulf %60, %165 : vector<2x128xf32>
    %167 = arith.addf %164, %166 : vector<2x128xf32>
    %168 = vector.broadcast %19 : f32 to vector<2x128xf32>
    %169 = arith.mulf %68, %168 : vector<2x128xf32>
    %170 = arith.addf %167, %169 : vector<2x128xf32>
    %171 = vector.broadcast %20 : f32 to vector<2x128xf32>
    %172 = arith.mulf %76, %171 : vector<2x128xf32>
    %173 = arith.addf %170, %172 : vector<2x128xf32>
    %174 = vector.broadcast %40 : f32 to vector<2x128xf32>
    %175 = arith.addf %173, %174 : vector<2x128xf32>
    %cst_105 = arith.constant 0.000000e+00 : f32
    %176 = vector.broadcast %cst_105 : f32 to vector<2x128xf32>
    %177 = arith.cmpf ogt, %175, %176 : vector<2x128xf32>
    %cst_106 = arith.constant 1.000000e+00 : f32
    %cst_107 = arith.constant 2.000000e-01 : f32
    %178 = vector.broadcast %cst_106 : f32 to vector<2x128xf32>
    %179 = vector.broadcast %cst_107 : f32 to vector<2x128xf32>
    %180 = arith.select %177, %178, %179 : vector<2x128xi1>, vector<2x128xf32>
    %181 = vector.broadcast %17 : f32 to vector<2x128xf32>
    %182 = arith.mulf %180, %181 : vector<2x128xf32>
    %183 = arith.addf %153, %182 : vector<2x128xf32>
    %184 = vector.broadcast %18 : f32 to vector<2x128xf32>
    %185 = arith.mulf %180, %184 : vector<2x128xf32>
    %186 = arith.addf %156, %185 : vector<2x128xf32>
    %187 = vector.broadcast %19 : f32 to vector<2x128xf32>
    %188 = arith.mulf %180, %187 : vector<2x128xf32>
    %189 = arith.addf %159, %188 : vector<2x128xf32>
    %190 = vector.broadcast %20 : f32 to vector<2x128xf32>
    %191 = arith.mulf %180, %190 : vector<2x128xf32>
    %192 = arith.addf %162, %191 : vector<2x128xf32>
    %193 = vector.broadcast %21 : f32 to vector<2x128xf32>
    %194 = arith.mulf %52, %193 : vector<2x128xf32>
    %195 = vector.broadcast %22 : f32 to vector<2x128xf32>
    %196 = arith.mulf %60, %195 : vector<2x128xf32>
    %197 = arith.addf %194, %196 : vector<2x128xf32>
    %198 = vector.broadcast %23 : f32 to vector<2x128xf32>
    %199 = arith.mulf %68, %198 : vector<2x128xf32>
    %200 = arith.addf %197, %199 : vector<2x128xf32>
    %201 = vector.broadcast %24 : f32 to vector<2x128xf32>
    %202 = arith.mulf %76, %201 : vector<2x128xf32>
    %203 = arith.addf %200, %202 : vector<2x128xf32>
    %204 = vector.broadcast %41 : f32 to vector<2x128xf32>
    %205 = arith.addf %203, %204 : vector<2x128xf32>
    %cst_108 = arith.constant 0.000000e+00 : f32
    %206 = vector.broadcast %cst_108 : f32 to vector<2x128xf32>
    %207 = arith.cmpf ogt, %205, %206 : vector<2x128xf32>
    %cst_109 = arith.constant 1.000000e+00 : f32
    %cst_110 = arith.constant 2.000000e-01 : f32
    %208 = vector.broadcast %cst_109 : f32 to vector<2x128xf32>
    %209 = vector.broadcast %cst_110 : f32 to vector<2x128xf32>
    %210 = arith.select %207, %208, %209 : vector<2x128xi1>, vector<2x128xf32>
    %211 = vector.broadcast %21 : f32 to vector<2x128xf32>
    %212 = arith.mulf %210, %211 : vector<2x128xf32>
    %213 = arith.addf %183, %212 : vector<2x128xf32>
    %214 = vector.broadcast %22 : f32 to vector<2x128xf32>
    %215 = arith.mulf %210, %214 : vector<2x128xf32>
    %216 = arith.addf %186, %215 : vector<2x128xf32>
    %217 = vector.broadcast %23 : f32 to vector<2x128xf32>
    %218 = arith.mulf %210, %217 : vector<2x128xf32>
    %219 = arith.addf %189, %218 : vector<2x128xf32>
    %220 = vector.broadcast %24 : f32 to vector<2x128xf32>
    %221 = arith.mulf %210, %220 : vector<2x128xf32>
    %222 = arith.addf %192, %221 : vector<2x128xf32>
    %223 = vector.broadcast %25 : f32 to vector<2x128xf32>
    %224 = arith.mulf %52, %223 : vector<2x128xf32>
    %225 = vector.broadcast %26 : f32 to vector<2x128xf32>
    %226 = arith.mulf %60, %225 : vector<2x128xf32>
    %227 = arith.addf %224, %226 : vector<2x128xf32>
    %228 = vector.broadcast %27 : f32 to vector<2x128xf32>
    %229 = arith.mulf %68, %228 : vector<2x128xf32>
    %230 = arith.addf %227, %229 : vector<2x128xf32>
    %231 = vector.broadcast %28 : f32 to vector<2x128xf32>
    %232 = arith.mulf %76, %231 : vector<2x128xf32>
    %233 = arith.addf %230, %232 : vector<2x128xf32>
    %234 = vector.broadcast %42 : f32 to vector<2x128xf32>
    %235 = arith.addf %233, %234 : vector<2x128xf32>
    %cst_111 = arith.constant 0.000000e+00 : f32
    %236 = vector.broadcast %cst_111 : f32 to vector<2x128xf32>
    %237 = arith.cmpf ogt, %235, %236 : vector<2x128xf32>
    %cst_112 = arith.constant 1.000000e+00 : f32
    %cst_113 = arith.constant 2.000000e-01 : f32
    %238 = vector.broadcast %cst_112 : f32 to vector<2x128xf32>
    %239 = vector.broadcast %cst_113 : f32 to vector<2x128xf32>
    %240 = arith.select %237, %238, %239 : vector<2x128xi1>, vector<2x128xf32>
    %241 = vector.broadcast %25 : f32 to vector<2x128xf32>
    %242 = arith.mulf %240, %241 : vector<2x128xf32>
    %243 = arith.addf %213, %242 : vector<2x128xf32>
    %244 = vector.broadcast %26 : f32 to vector<2x128xf32>
    %245 = arith.mulf %240, %244 : vector<2x128xf32>
    %246 = arith.addf %216, %245 : vector<2x128xf32>
    %247 = vector.broadcast %27 : f32 to vector<2x128xf32>
    %248 = arith.mulf %240, %247 : vector<2x128xf32>
    %249 = arith.addf %219, %248 : vector<2x128xf32>
    %250 = vector.broadcast %28 : f32 to vector<2x128xf32>
    %251 = arith.mulf %240, %250 : vector<2x128xf32>
    %252 = arith.addf %222, %251 : vector<2x128xf32>
    %253 = vector.broadcast %29 : f32 to vector<2x128xf32>
    %254 = arith.mulf %52, %253 : vector<2x128xf32>
    %255 = vector.broadcast %30 : f32 to vector<2x128xf32>
    %256 = arith.mulf %60, %255 : vector<2x128xf32>
    %257 = arith.addf %254, %256 : vector<2x128xf32>
    %258 = vector.broadcast %31 : f32 to vector<2x128xf32>
    %259 = arith.mulf %68, %258 : vector<2x128xf32>
    %260 = arith.addf %257, %259 : vector<2x128xf32>
    %261 = vector.broadcast %32 : f32 to vector<2x128xf32>
    %262 = arith.mulf %76, %261 : vector<2x128xf32>
    %263 = arith.addf %260, %262 : vector<2x128xf32>
    %264 = vector.broadcast %43 : f32 to vector<2x128xf32>
    %265 = arith.addf %263, %264 : vector<2x128xf32>
    %cst_114 = arith.constant 0.000000e+00 : f32
    %266 = vector.broadcast %cst_114 : f32 to vector<2x128xf32>
    %267 = arith.cmpf ogt, %265, %266 : vector<2x128xf32>
    %cst_115 = arith.constant 1.000000e+00 : f32
    %cst_116 = arith.constant 2.000000e-01 : f32
    %268 = vector.broadcast %cst_115 : f32 to vector<2x128xf32>
    %269 = vector.broadcast %cst_116 : f32 to vector<2x128xf32>
    %270 = arith.select %267, %268, %269 : vector<2x128xi1>, vector<2x128xf32>
    %271 = vector.broadcast %29 : f32 to vector<2x128xf32>
    %272 = arith.mulf %270, %271 : vector<2x128xf32>
    %273 = arith.addf %243, %272 : vector<2x128xf32>
    %274 = vector.broadcast %30 : f32 to vector<2x128xf32>
    %275 = arith.mulf %270, %274 : vector<2x128xf32>
    %276 = arith.addf %246, %275 : vector<2x128xf32>
    %277 = vector.broadcast %31 : f32 to vector<2x128xf32>
    %278 = arith.mulf %270, %277 : vector<2x128xf32>
    %279 = arith.addf %249, %278 : vector<2x128xf32>
    %280 = vector.broadcast %32 : f32 to vector<2x128xf32>
    %281 = arith.mulf %270, %280 : vector<2x128xf32>
    %282 = arith.addf %252, %281 : vector<2x128xf32>
    %283 = vector.broadcast %33 : f32 to vector<2x128xf32>
    %284 = arith.mulf %52, %283 : vector<2x128xf32>
    %285 = vector.broadcast %34 : f32 to vector<2x128xf32>
    %286 = arith.mulf %60, %285 : vector<2x128xf32>
    %287 = arith.addf %284, %286 : vector<2x128xf32>
    %288 = vector.broadcast %35 : f32 to vector<2x128xf32>
    %289 = arith.mulf %68, %288 : vector<2x128xf32>
    %290 = arith.addf %287, %289 : vector<2x128xf32>
    %291 = vector.broadcast %36 : f32 to vector<2x128xf32>
    %292 = arith.mulf %76, %291 : vector<2x128xf32>
    %293 = arith.addf %290, %292 : vector<2x128xf32>
    %294 = vector.broadcast %44 : f32 to vector<2x128xf32>
    %295 = arith.addf %293, %294 : vector<2x128xf32>
    %cst_117 = arith.constant 0.000000e+00 : f32
    %296 = vector.broadcast %cst_117 : f32 to vector<2x128xf32>
    %297 = arith.cmpf ogt, %295, %296 : vector<2x128xf32>
    %cst_118 = arith.constant 1.000000e+00 : f32
    %cst_119 = arith.constant 2.000000e-01 : f32
    %298 = vector.broadcast %cst_118 : f32 to vector<2x128xf32>
    %299 = vector.broadcast %cst_119 : f32 to vector<2x128xf32>
    %300 = arith.select %297, %298, %299 : vector<2x128xi1>, vector<2x128xf32>
    %301 = vector.broadcast %33 : f32 to vector<2x128xf32>
    %302 = arith.mulf %300, %301 : vector<2x128xf32>
    %303 = arith.addf %273, %302 : vector<2x128xf32>
    %304 = vector.broadcast %34 : f32 to vector<2x128xf32>
    %305 = arith.mulf %300, %304 : vector<2x128xf32>
    %306 = arith.addf %276, %305 : vector<2x128xf32>
    %307 = vector.broadcast %35 : f32 to vector<2x128xf32>
    %308 = arith.mulf %300, %307 : vector<2x128xf32>
    %309 = arith.addf %279, %308 : vector<2x128xf32>
    %310 = vector.broadcast %36 : f32 to vector<2x128xf32>
    %311 = arith.mulf %300, %310 : vector<2x128xf32>
    %312 = arith.addf %282, %311 : vector<2x128xf32>
    %313 = arith.mulf %303, %303 : vector<2x128xf32>
    %314 = arith.mulf %306, %306 : vector<2x128xf32>
    %315 = arith.addf %313, %314 : vector<2x128xf32>
    %316 = arith.mulf %309, %309 : vector<2x128xf32>
    %317 = arith.addf %315, %316 : vector<2x128xf32>
    %318 = arith.mulf %312, %312 : vector<2x128xf32>
    %319 = arith.addf %317, %318 : vector<2x128xf32>
    %320 = math.sqrt %319 : vector<2x128xf32>
    %cst_120 = arith.constant 1.000000e+00 : f32
    %321 = vector.broadcast %cst_120 : f32 to vector<2x128xf32>
    %322 = arith.subf %320, %321 : vector<2x128xf32>
    %323 = arith.mulf %322, %322 : vector<2x128xf32>
    %c0_121 = arith.constant 0 : index
    %c0_122 = arith.constant 0 : index
    %324 = vector.load %arg8[%c0_121, %c0_122] : memref<8x128xf32, #tpu.memory_space<vmem>>, vector<2x128xf32>
    %325 = arith.addf %324, %323 : vector<2x128xf32>
    %c0_123 = arith.constant 0 : index
    %c0_124 = arith.constant 0 : index
    %326 = vector.load %arg8[%c0_123, %c0_124] : memref<8x128xf32, #tpu.memory_space<vmem>>, vector<2x128xf32>
    tpu.vector_store %arg8[%c0_123, %c0_124], %325 {strides = array<i32>} : memref<8x128xf32, #tpu.memory_space<vmem>>, vector<2x128xf32>,
    %c0_i32_125 = arith.constant 0 : i32
    %327 = arith.cmpi eq, %arg1, %c0_i32_125 : i32
    %328 = arith.extui %327 : i1 to i32
    %c0_i32_126 = arith.constant 0 : i32
    %329 = arith.cmpi ne, %328, %c0_i32_126 : i32
    scf.if %329 {
      %c0_127 = arith.constant 0 : index
      %c0_128 = arith.constant 0 : index
      %330 = vector.load %arg8[%c0_127, %c0_128] : memref<8x128xf32, #tpu.memory_space<vmem>>, vector<8x128xf32>
      %331 = vector.shape_cast %330 : vector<8x128xf32> to vector<1x8x128xf32>
      %cst_129 = arith.constant dense<0.000000e+00> : vector<1xf32>
      %332 = vector.multi_reduction <add>, %331, %cst_129 [1, 2] : vector<1x8x128xf32> to vector<1xf32>
      %333 = vector.shape_cast %332 : vector<1xf32> to vector<1x1x1xf32>
      %334 = vector.extract %333[0, 0, 0] : f32 from vector<1x1x1xf32>
      %335 = vector.broadcast %334 : f32 to vector<1x1x1xf32>
      %c0_130 = arith.constant 0 : index
      %c0_131 = arith.constant 0 : index
      %c0_132 = arith.constant 0 : index
      %336 = vector.load %arg7[%c0_130, %c0_131, %c0_132] : memref<1x1x1xf32, #tpu.memory_space<vmem>>, vector<1x1x1xf32>
      tpu.vector_store %arg7[%c0_130, %c0_131, %c0_132], %335 {strides = array<i32>} : memref<1x1x1xf32, #tpu.memory_space<vmem>>, vector<1x1x1xf32>,
    } else {
    }
    return
  }
  func.func @transform_0(%arg0: i32, %arg1: i32) -> i32 {
    %c0_i32 = arith.constant 0 : i32
    %c0_i32_0 = arith.constant 0 : i32
    return %c0_i32 : i32
  }
  func.func @transform_1(%arg0: i32, %arg1: i32) -> (i32, i32) {
    %c0_i32 = arith.constant 0 : i32
    %c0_i32_0 = arith.constant 0 : i32
    %c0_i32_1 = arith.constant 0 : i32
    return %c0_i32, %c0_i32_0 : i32, i32
  }
  func.func @transform_2(%arg0: i32, %arg1: i32) -> i32 {
    %c0_i32 = arith.constant 0 : i32
    %c0_i32_0 = arith.constant 0 : i32
    return %c0_i32 : i32
  }
  func.func @transform_3(%arg0: i32, %arg1: i32) -> (i32, i32, i32, i32) {
    %c0_i32 = arith.constant 0 : i32
    %c0_i32_0 = arith.constant 0 : i32
    %c0_i32_1 = arith.constant 0 : i32
    return %arg0, %c0_i32, %arg1, %c0_i32_0 : i32, i32, i32, i32
  }
  func.func @transform_4(%arg0: i32, %arg1: i32) -> (i32, i32, i32, i32) {
    %c0_i32 = arith.constant 0 : i32
    %c0_i32_0 = arith.constant 0 : i32
    %c0_i32_1 = arith.constant 0 : i32
    return %arg0, %c0_i32, %arg1, %c0_i32_0 : i32, i32, i32, i32
  }
  func.func @transform_5(%arg0: i32, %arg1: i32) -> (i32, i32, i32) {
    %c0_i32 = arith.constant 0 : i32
    %c0_i32_0 = arith.constant 0 : i32
    %c0_i32_1 = arith.constant 0 : i32
    return %arg0, %c0_i32, %c0_i32_0 : i32, i32, i32
  }
}

</mosaic_0001>

<bundles_post_ra>
// kernel: tpu_custom_call.1
= control target key start
LH: loop header
LB: loop body
LE: loop exit
PB: predicated region body
PF: predicated region fallthrough
CT: control target
= control target key end

     0   :  { %s1512_s0 = inlined_call_operand.vmem [shape: f32[2], index: 0, kind: input, shape index: {}]   ;;  %s1513_s1 = inlined_call_operand.vmem [shape: f32[8,4], index: 1, kind: input, shape index: {}]   ;;  %s1514_s2 = inlined_call_operand.hbm [shape: f32[8], index: 2, kind: input, shape index: {}]   ;;  %s1515_s3 = inlined_call_operand.vmem [shape: f32[2,4,2,128], index: 3, kind: input, shape index: {}]   ;;  %s1516_s4 = inlined_call_operand.hbm [shape: f32[2,4,2,128], index: 4, kind: input, shape index: {}]   ;;  %s1517_s5 = inlined_call_operand.vmem [shape: f32[2,1,1], index: 5, kind: output, shape index: {}]  }
   0x1   :  { %1535 = sst [smem:[#allocation29_spill]] %s1512_s0 }
   0x2   :  { %1536 = sst [smem:[#allocation30_spill]] %s1513_s1 }
   0x3   :  { %1537 = sst [smem:[#allocation31_spill]] %s1514_s2 }
   0x4   :  { %1538 = sst [smem:[#allocation32_spill]] %s1515_s3 }
   0x5   :  { %1539 = sst [smem:[#allocation33_spill]] %s1516_s4 }
   0x6   :  { %1540 = sst [smem:[#allocation34_spill]] %s1517_s5 }
   0x7   :  { %10 = vsyncpa [#allocation6], 0 }
   0x8   :  { %11 = vsyncpa [#allocation8], 0 }
   0x9   :  { %12 = vsyncpa [#allocation5], 0 }
   0xa   :  { %13 = vsyncpa [#allocation4], 0 }
   0xb   :  { %15 = vsyncpa [#allocation4 + $0x1], 0  ;;  %s1065_s18 = smov 0   ;;  %s1067_s19 = smov 0  }
   0xc   :  { %s1069_s20 = smov 0   ;;  %s1071_s21 = smov 0  }
   0xd   :  { %s1073_s22 = smov 0   ;;  %s1075_s23 = smov 0  }
   0xe LB: > { %1541 = sst [smem:[#allocation15_spill]] %s1009_s19  ;;  %s734_s24 = sadd.s32 4294967295, %s1025_s23   ;;  %s1025_s23 = sphi %s1075_s23, %s21_s23   ;;  %s1021_s22 = sphi %s1073_s22, %s1582_s22   ;;  %s1017_s21 = sphi %s1071_s21, %s1581_s21   ;;  %s1013_s20 = sphi %s1069_s20, %s1580_s20   ;;  %s1009_s19 = sphi %s1067_s19, %s1579_s19   ;;  %s1005_s18 = sphi %s1065_s18, %s1578_s18  }
   0xf   : > { %1542 = sst [smem:[#allocation16_spill]] %s1013_s20  ;;  %p146_p0 = scmp.ne.s32.totalorder %s1009_s19, %s1005_s18 }
  0x10   : > { %1543 = sst [smem:[#allocation17_spill]] %s1021_s22  ;;  %p1095_p1 = scmp.eq.s32.totalorder %s734_s24, 0 }
  0x11   : > { %1544 = sst [smem:[#allocation18_spill]] %s1025_s23  ;;  %p736_p2 = scmp.ge.s32.totalorder %s1025_s23, 1 }
  0x12   : > { %s1545_s25 = scalar_select %p1095_p1, 1, 0 }
  0x13   : > { %p183_p3 = scmp.lt.s32.totalorder %s1025_s23, 3  ;;  %p1103_p4 = por %p1095_p1, %p146_p0 }
  0x14   : > { %s1547_s0 = sld [smem:[#allocation29_spill]] }
  0x15   : > { %s1546_s26 = scalar_select %p1103_p4, 1, 0 }
  0x16   : > { %p1110_p5 = pnand %p736_p2, %p183_p3  ;;  %s1549_s1 = sld [smem:[#allocation30_spill]] }
  0x18   : > { %s1548_s30 = scalar_select %p1110_p5, 1, 0 }
  0x19   : > { %p816_p6 = pneg %p1110_p5 }
  0x1a   : > { %s196_s29 = sshll.u32 %s1547_s0, 4  ;;  %s197_s29 = int_to_ptr.vmem [resolvable:$true] %s196_s29 }
  0x1b   : > { %p1121_p7 = pnand %p816_p6, %p1095_p1  ;;  %s894_s10 = scalar_lea.vmem %s197_s29, 16 }
  0x1c   : > { %s207_s8 = sshll.u32 %s1549_s1, 4  ;;  %p895_p8 = scmp.ne.s32.totalorder %s197_s29, %s894_s10  ;;  %s208_s8 = int_to_ptr.vmem [resolvable:$true] %s207_s8 }
  0x1d   : > { %p896_p9 = pneg %p1121_p7  ;;  %p902_p12 = scmp.lt.s32.totalorder %s197_s29, %s197_s29 }
  0x1e   : > { %p903_p13 = scmp.lt.s32.totalorder %s894_s10, %s894_s10 }
  0x1f   : > { %p897_p10 = pnand %p896_p9, %p895_p8 }
  0x20   : > { %p904_p0 = por %p903_p13, %p902_p12 }
  0x21   : > { %p898_p11 = pneg %p897_p10 }
  0x23   : > { %p905_p2 = pnand %p904_p0, %p898_p11 }
  0x25   : > { %908 = shalt.err (!%p905_p2)
}
  0x26   : > { %s1027_s11 = smov [#allocation3]   ;;  %s909_s12 = scalar_lea.vmem %s208_s8, 128 }
  0x27   : > { %819 = dma.vmem_to_smem (!%p1121_p7), %s197_s29, 16, %s1027_s11, [#allocation6]  }
  0x28   : > { %p910_p3 = scmp.ne.s32.totalorder %s208_s8, %s909_s12  ;;  %p917_p1 = scmp.lt.s32.totalorder %s208_s8, %s208_s8 }
  0x29   : > { %p918_p5 = scmp.lt.s32.totalorder %s909_s12, %s909_s12 }
  0x2a   : > { %p912_p6 = pnand %p910_p3, %p896_p9 }
  0x2b   : > { %p919_p8 = por %p918_p5, %p917_p1 }
  0x2c   : > { %p913_p4 = pneg %p912_p6 }
  0x2e   : > { %p920_p10 = pnand %p919_p8, %p913_p4 }
  0x30   : > { %923 = shalt.err (!%p920_p10)
}
  0x31   : > { %s1028_s13 = smov [#allocation7]   ;;  %s1029_s14 = smov [#allocation9]  }
  0x32   : > { %822 = dma.vmem_to_smem (!%p1121_p7), %s208_s8, 128, %s1028_s13, [#allocation8]  }
  0x33   : > { %s1551_s2 = sld [smem:[#allocation31_spill]]  ;;  %s33_s17 = sadd.s32 1, %s1021_s22 }
  0x34   : > { %p35_p1 = scmp.ge.s32.totalorder %s33_s17, 2  ;;  %s133_s18 = sadd.s32 1, %s1013_s20 }
  0x35   : > { %p140_p4 = scmp.ne.s32.totalorder %s1013_s20, %s1009_s19  ;;  %p141_p5 = scmp.eq.s32.totalorder %s1025_s23, 0 }
  0x36   : > { %s1584_s17 = smov (%p35_p1, %s33_s17), 0  ;;  %p833_p11 = scmp.lt.s32.totalorder %s1025_s23, 2 }
  0x37   : > { %1552 = sst [smem:[#allocation19_spill]] %s1584_s17  ;;  %p142_p9 = por %p141_p5, %p140_p4 }
  0x38   : > { %s128_s24 = ssub.s32 %s1021_s22, %s1584_s17  ;;  %s238_s27 = sand.u32 1, %s1013_s20  }
  0x39   : > { %825 = dma.hbm_to_smem (!%p1121_p7), %s1551_s2, 16, %s1029_s14, [#allocation5]  }
  0x3a   : > { %p131_p12 = scmp.eq.s32.totalorder %s128_s24, 0  ;;  %s741_s28 = sshll.u32 %s238_s27, 3 }
  0x3b   : > { %s798_s29 = sshll.u32 %s1021_s22, 7  ;;  %s1554_s4 = sld [smem:[#allocation33_spill]] }
  0x3c   : > { %s1149_s6 = scalar_select %p131_p12, %s1013_s20, %s133_s18  }
  0x3d   : > { %s242_s10 = scalar_lea.vmem [#allocation10], %s741_s28  ;;  %p1154_p7 = pnand %p833_p11, %p142_p9 }
  0x3e   : > { %1553 = sst [smem:[#allocation20_spill]] %s1149_s6  ;;  %s250_s11 = sshll.u32 %s242_s10, 4  ;;  %s251_s11 = int_to_ptr.vmem [resolvable:$true] %s250_s11 }
  0x3f   : > { %s239_s13 = scalar_lea.sflag [#allocation4], %s238_s27  ;;  %p937_p13 = pneg %p1154_p7 }
  0x40   : > { %s948_s14 = scalar_lea.vmem %s251_s11, 128  ;;  %s1030_s15 = smov [#allocation10]  }
  0x41   : > { %s249_s9 = scalar_lea.hbm %s1554_s4, %s798_s29  ;;  %p949_p0 = scmp.ne.s32.totalorder %s251_s11, %s948_s14 }
  0x42   : > { %s953_s16 = sshll.u32 %s1030_s15, 4  ;;  %s954_s16 = int_to_ptr.vmem [resolvable:$false] %s953_s16 }
  0x43   : > { %p951_p2 = pnand %p949_p0, %p937_p13  ;;  %s955_s18 = scalar_lea.vmem %s954_s16, 256 }
  0x44   : > { %p956_p6 = scmp.lt.s32.totalorder %s251_s11, %s954_s16  ;;  %p957_p8 = scmp.lt.s32.totalorder %s955_s18, %s948_s14 }
  0x45   : > { %p952_p3 = pneg %p951_p2 }
  0x46   : > { %p958_p10 = por %p957_p8, %p956_p6 }
  0x48   : > { %p959_p1 = pnand %p958_p10, %p952_p3 }
  0x4a   : > { %962 = shalt.err (!%p959_p1)
}
  0x4b   : > { %s1031_s24 = smov 32   ;;  %s1032_s28 = smov 2  }
  0x4c   : > { %829 = dma.hbm_to_vmem [thread:$0]  (!%p1154_p7), %s249_s9, 128, %s251_s11, %s239_s13, %s1031_s24, %s1031_s24, %s1032_s28  }
  0x4d   : > { %p1556_p4 = scmp.ne.s32.totalorder %s1548_s30, 0 }
  0x4f   : > { %262 = sbr.rel (%p1556_p4) target bundleno = 417 (0x1a1), region = 40 }
  0x54   : > { %p1557_p5 = scmp.ne.s32.totalorder %s1545_s25, 0 }
  0x56   : > { %988 = dma.done.wait (%p1557_p5), [#allocation6], 16  }
  0x57   : > { %990 = vsyncadd (%p1557_p5), [#allocation6], 4294967280 }
  0x58   : > { %992 = dma.done.wait (%p1557_p5), [#allocation8], 128  }
  0x59   : > { %994 = vsyncadd (%p1557_p5), [#allocation8], 4294967168 }
  0x5a   : > { %996 = dma.done.wait (%p1557_p5), [#allocation5], 16  }
  0x5b   : > { %998 = vsyncadd (%p1557_p5), [#allocation5], 4294967280  ;;  %s276_s30 = sand.u32 1, %s1009_s19   ;;  %p1558_p9 = scmp.ne.s32.totalorder %s1546_s26, 0 }
  0x5c   : > { %s748_s27 = sshll.u32 %s276_s30, 3  ;;  %s277_s29 = scalar_lea.sflag [#allocation4], %s276_s30 }
  0x5d   : > { %s280_s7 = scalar_lea.vmem [#allocation10], %s748_s27 }
  0x5e   : > { %1000 = dma.done.wait (%p1558_p9), %s277_s29, 128  }
  0x5f   : > { %1002 = vsyncadd (%p1558_p9), %s277_s29, 4294967168 }
  0x60   : > { %285 = sfence }
  0x61   : > { %p314_p11 = scmp.lt.s32.totalorder %s1017_s21, 1  ;;  %s330_s8 = sld [smem:[#allocation3 + %s1017_s21]]  ;;  %v1033_v0 = vmov 0.0   ;;  %v372_v1 = vld [vmem:[%s280_s7] sm:$0x3]  ;;  %vm611_vm10 = vcmask 0  }
  0x62   : > { %329 = vst [vmem:[#allocation2] sm:$0xff] %v1033_v0  ;;  %s1186_s25 = sld [smem:[#allocation7]]  ;;  %v790_v2 = vld [vmem:[%s280_s7 + $0x2] sm:$0x3]  ;;  %v792_v3 = vld [vmem:[%s280_s7 + $0x4] sm:$0x3] }
  0x63   : > { %s1586_s21 = smov (!%p314_p11, %s1017_s21), 1  ;;  %s1189_s10 = sld [smem:[#allocation7 + $0x1]]  ;;  %v794_v12 = vld [vmem:[%s280_s7 + $0x6] sm:$0x3] }
  0x64   : > { %1559 = sst [smem:[#allocation21_spill]] %s1586_s21  ;;  %s799_s9 = sshll.u32 %s1586_s21, 3 }
  0x65   : > { %s1560_s3 = sld [smem:[#allocation32_spill]] }
  0x66   : > { %s1194_s13 = sld [smem:[#allocation7 + $0x2]] }
  0x67   : > { %s1196_s14 = sld [smem:[#allocation7 + $0x3]]  ;;  %v374_v5 = vstv %s330_s8 }
  0x68   : > { %s1198_s15 = sld [smem:[#allocation7 + $0x80]]  ;;  %v398_v19 = vstv %s1186_s25 }
  0x69   : > { %s1200_s16 = sld [smem:[#allocation7 + $0x81]]  ;;  %v400_v20 = vstv %s1189_s10 }
  0x6a   : > { %s1202_s18 = sld [smem:[#allocation7 + $0x82]] }
  0x6b   : > { %s321_s12 = scalar_lea.vmem %s1560_s3, %s799_s9  ;;  %s1204_s24 = sld [smem:[#allocation7 + $0x83]] }
  0x6c   : > { %v371_v4 = vld [vmem:[%s321_s12] sm:$0x3]  ;;  %v789_v6 = vld [vmem:[%s321_s12 + $0x2] sm:$0x3]  ;;  %v791_v9 = vld [vmem:[%s321_s12 + $0x4] sm:$0x3]  ;;  %v403_v27 = vstv %s1194_s13 }
  0x6d   : > { %v373_v7 = vsub.f32 %v371_v4, %v372_v1  ;;  %v381_v8 = vsub.f32 %v789_v6, %v790_v2  ;;  %v388_v10 = vsub.f32 %v791_v9, %v792_v3  ;;  %v793_v11 = vld [vmem:[%s321_s12 + $0x6] sm:$0x3]  ;;  %s1206_s28 = sld [smem:[#allocation7 + $0x100]]  ;;  %v406_v34 = vstv %s1196_s14 }
  0x6e   : > { %v395_v16 = vsub.f32 %v793_v11, %v794_v12  ;;  %s1208_s30 = sld [smem:[#allocation7 + $0x101]]  ;;  %v417_v25 = vstv %s1198_s15 }
  0x6f   : > { %v375_v13 = vmul.f32 %v374_v5, %v373_v7  ;;  %v382_v14 = vmul.f32 %v381_v8, %v374_v5  ;;  %v389_v15 = vmul.f32 %v388_v10, %v374_v5  ;;  %s1214_s27 = sld [smem:[#allocation7 + $0x102]]  ;;  %v419_v26 = vstv %s1200_s16 }
  0x70   : > { %s1218_s29 = sld [smem:[#allocation7 + $0x103]]  ;;  %v396_v22 = vmul.f32 %v395_v16, %v374_v5  ;;  %v422_v33 = vstv %s1202_s18 }
  0x71   : > { %v1210_v17 = vadd.f32 %v375_v13, %v372_v1  ;;  %v1212_v18 = vadd.f32 %v790_v2, %v382_v14  ;;  %s1220_s7 = sld [smem:[#allocation7 + $0x180]]  ;;  %v1222_v21 = vadd.f32 %v792_v3, %v389_v15  ;;  %v425_v37 = vstv %s1204_s24 }
  0x72   : > { %s1224_s8 = sld [smem:[#allocation7 + $0x181]]  ;;  %v1249_v30 = vadd.f32 %v794_v12, %v396_v22 }
  0x73   : > { %v399_v23 = vmul.f32 %v398_v19, %v1210_v17  ;;  %v401_v24 = vmul.f32 %v400_v20, %v1212_v18  ;;  %s1234_s9 = sld [smem:[#allocation7 + $0x182]]  ;;  %v418_v28 = vmul.f32 %v417_v25, %v1210_v17  ;;  %v420_v29 = vmul.f32 %v419_v26, %v1212_v18 }
  0x74   : > { %s1237_s26 = sld [smem:[#allocation7 + $0x183]]  ;;  %v404_v32 = vmul.f32 %v403_v27, %v1222_v21  ;;  %v423_v36 = vmul.f32 %v422_v33, %v1222_v21  ;;  %v407_v39 = vmul.f32 %v406_v34, %v1249_v30  ;;  %v440_v40 = vstv %s1206_s28 }
  0x75   : > { %s1239_s11 = sld [smem:[#allocation7 + $0x200]]  ;;  %v402_v31 = vadd.f32 %v401_v24, %v399_v23  ;;  %v421_v35 = vadd.f32 %v420_v29, %v418_v28  ;;  %v442_v41 = vstv %s1208_s30  ;;  %v426_v44 = vmul.f32 %v425_v37, %v1249_v30 }
  0x76   : > { %s1247_s12 = sld [smem:[#allocation7 + $0x201]]  ;;  %v441_v48 = vmul.f32 %v440_v40, %v1210_v17  ;;  %v443_v49 = vmul.f32 %v442_v41, %v1212_v18  ;;  %v445_v50 = vstv %s1214_s27  ;;  %v448_v52 = vstv %s1218_s29 }
  0x77   : > { %s1255_s0 = sld [smem:[#allocation7 + $0x202]]  ;;  %v405_v38 = vadd.f32 %v404_v32, %v402_v31  ;;  %v463_v42 = vstv %s1220_s7  ;;  %v424_v47 = vadd.f32 %v423_v36, %v421_v35  ;;  %v446_v59 = vmul.f32 %v445_v50, %v1222_v21 }
  0x78   : > { %s1258_s1 = sld [smem:[#allocation7 + $0x203]]  ;;  %v465_v43 = vstv %s1224_s8  ;;  %v464_v53 = vmul.f32 %v463_v42, %v1210_v17  ;;  %v444_v0 = vadd.f32 %v443_v49, %v441_v48  ;;  %v449_v3 = vmul.f32 %v448_v52, %v1249_v30 }
  0x79   : > { %s1260_s2 = sld [smem:[#allocation7 + $0x280]]  ;;  %v1295_v51 = vadd.f32 %v407_v39, %v405_v38  ;;  %v466_v54 = vmul.f32 %v465_v43, %v1212_v18  ;;  %v468_v55 = vstv %s1234_s9  ;;  %v427_v63 = vadd.f32 %v426_v44, %v424_v47 }
  0x7a   : > { %s1266_s3 = sld [smem:[#allocation7 + $0x281]]  ;;  %v469_v5 = vmul.f32 %v468_v55, %v1222_v21  ;;  %v471_v6 = vstv %s1237_s26  ;;  %v447_v15 = vadd.f32 %v446_v59, %v444_v0 }
  0x7b   : > { %s1273_s4 = sld [smem:[#allocation7 + $0x282]]  ;;  %v486_v45 = vstv %s1239_s11  ;;  %v467_v4 = vadd.f32 %v466_v54, %v464_v53  ;;  %v472_v28 = vmul.f32 %v471_v6, %v1249_v30 }
  0x7c   : > { %s1277_s17 = sld [smem:[#allocation7 + $0x283]]  ;;  %v488_v46 = vstv %s1247_s12  ;;  %v487_v56 = vmul.f32 %v486_v45, %v1210_v17 }
  0x7d   : > { %1561 = sst [smem:[#allocation22_spill]] %s1255_s0  ;;  %v489_v57 = vmul.f32 %v488_v46, %v1212_v18  ;;  %v491_v60 = vstv %s1255_s0  ;;  %v470_v24 = vadd.f32 %v469_v5, %v467_v4 }
  0x7e   : > { %s1284_s22 = sld [smem:[#allocation7 + $0x300]]  ;;  %v492_v8 = vmul.f32 %v491_v60, %v1222_v21  ;;  %v494_v9 = vstv %s1258_s1 }
  0x7f   : > { %1562 = sst [smem:[#allocation23_spill]] %s1260_s2  ;;  %v509_v58 = vstv %s1260_s2  ;;  %v490_v7 = vadd.f32 %v489_v57, %v487_v56  ;;  %v495_v35 = vmul.f32 %v494_v9, %v1249_v30  ;;  %v450_v57 = vadd.f32 %v449_v3, %v447_v15 }
  0x80   : > { %1563 = sst [smem:[#allocation24_spill]] %s1266_s3  ;;  %v510_v61 = vmul.f32 %v509_v58, %v1210_v17  ;;  %v511_v62 = vstv %s1266_s3  ;;  %v473_v0 = vadd.f32 %v472_v28, %v470_v24 }
  0x81   : > { %s1293_s6 = sld [smem:[#allocation7 + $0x301]]  ;;  %v512_v1 = vmul.f32 %v511_v62, %v1212_v18  ;;  %v514_v2 = vstv %s1273_s4  ;;  %v493_v32 = vadd.f32 %v492_v8, %v490_v7 }
  0x82   : > { %s1304_s20 = sld [smem:[#allocation7 + $0x302]]  ;;  %v515_v12 = vmul.f32 %v514_v2, %v1222_v21  ;;  %v517_v16 = vstv %s1277_s17 }
  0x83   : > { %s1314_s19 = sld [smem:[#allocation7 + $0x303]]  ;;  %v513_v11 = vadd.f32 %v512_v1, %v510_v61  ;;  %v518_v44 = vmul.f32 %v517_v16, %v1249_v30  ;;  %v496_v7 = vadd.f32 %v495_v35, %v493_v32 }
  0x84   : > { %1564 = sst [smem:[#allocation25_spill]] %s1284_s22  ;;  %v532_v10 = vstv %s1284_s22 }
  0x85   : > { %s1324_s23 = sld [smem:[#allocation7 + $0x380]]  ;;  %v533_v13 = vmul.f32 %v532_v10, %v1210_v17  ;;  %v516_v39 = vadd.f32 %v515_v12, %v513_v11 }
  0x86   : > { %s1330_s5 = sld [smem:[#allocation7 + $0x381]] }
  0x87   : > { %1565 = sst [smem:[#allocation26_spill]] %s1293_s6  ;;  %v534_v14 = vstv %s1293_s6 }
  0x88   : > { %1566 = sst [smem:[#allocation27_spill]] %s1304_s20  ;;  %v535_v22 = vmul.f32 %v534_v14, %v1212_v18  ;;  %v537_v23 = vstv %s1304_s20 }
  0x89   : > { %s1339_s21 = sld [smem:[#allocation7 + $0x382]]  ;;  %v538_v29 = vmul.f32 %v537_v23, %v1222_v21  ;;  %v540_v31 = vstv %s1314_s19 }
  0x8a   : > { %s1346_s3 = sld [smem:[#allocation7 + $0x383]]  ;;  %v536_v36 = vadd.f32 %v535_v22, %v533_v13  ;;  %v541_v53 = vmul.f32 %v540_v31, %v1249_v30 }
  0x8b   : > { %1567 = sst [smem:[#allocation28_spill]] %s1324_s23  ;;  %v555_v38 = vstv %s1324_s23 }
  0x8c   : > { %s1355_s2 = sld [smem:[#allocation9]]  ;;  %v556_v47 = vmul.f32 %v555_v38, %v1210_v17  ;;  %v557_v48 = vstv %s1330_s5  ;;  %v539_v49 = vadd.f32 %v538_v29, %v536_v36 }
  0x8d   : > { %s1362_s0 = sld [smem:[#allocation9 + $0x1]]  ;;  %v558_v54 = vmul.f32 %v557_v48, %v1212_v18  ;;  %v519_v18 = vadd.f32 %v518_v44, %v516_v39 }
  0x8e   : > { %s1371_s22 = sld [smem:[#allocation9 + $0x2]] }
  0x8f   : > { %s1377_s6 = sld [smem:[#allocation9 + $0x3]]  ;;  %v560_v56 = vstv %s1339_s21  ;;  %v559_v1 = vadd.f32 %v558_v54, %v556_v47 }
  0x90   : > { %s1386_s20 = sld [smem:[#allocation9 + $0x4]]  ;;  %v561_v59 = vmul.f32 %v560_v56, %v1222_v21  ;;  %v563_v61 = vstv %s1346_s3  ;;  %v542_v21 = vadd.f32 %v541_v53, %v539_v49 }
  0x91   : > { %s1399_s23 = sld [smem:[#allocation9 + $0x5]]  ;;  %v564_v11 = vmul.f32 %v563_v61, %v1249_v30 }
  0x92   : > { %v409_v17 = vstv %s1355_s2  ;;  %v562_v15 = vadd.f32 %v561_v59, %v559_v1  ;;  %s1430_s2 = sld [smem:[#allocation9 + $0x7]] }
  0x93   : > { %v410_v4 = vadd.f32 %v409_v17, %v1295_v51  ;;  %v428_v5 = vstv %s1362_s0  ;;  %v1034_v51 = vmov 0.2   ;;  %s1411_s0 = sld [smem:[#allocation9 + $0x6]] }
  0x94   : > { %v429_v8 = vadd.f32 %v428_v5, %v427_v63  ;;  %v451_v3 = vstv %s1371_s22  ;;  %s1575_s3 = sld [smem:[#allocation21_spill]] }
  0x95   : > { %vm411_vm0 = vcmp.gt.f32.partialorder %v410_v4, 0.0  ;;  %v452_v12 = vadd.f32 %v451_v3, %v450_v57  ;;  %v474_v13 = vstv %s1377_s6  ;;  %s1576_s19 = sld [smem:[#allocation34_spill]] }
  0x96   : > { %v412_v22 = vsel %vm411_vm0, 1.0, %v1034_v51  ;;  %vm430_vm1 = vcmp.gt.f32.partialorder %v429_v8, 0.0  ;;  %v475_v63 = vadd.f32 %v474_v13, %v473_v0  ;;  %v497_v24 = vstv %s1386_s20 }
  0x97   : > { %v413_v28 = vmul.f32 %v412_v22, %v398_v19  ;;  %v414_v30 = vmul.f32 %v412_v22, %v400_v20  ;;  %v415_v29 = vmul.f32 %v412_v22, %v403_v27  ;;  %v416_v32 = vmul.f32 %v412_v22, %v406_v34 }
  0x98   : > { %v431_v35 = vsel %vm430_vm1, 1.0, %v1034_v51  ;;  %vm453_vm2 = vcmp.gt.f32.partialorder %v452_v12, 0.0  ;;  %vm476_vm3 = vcmp.gt.f32.partialorder %v475_v63, 0.0  ;;  %v498_v36 = vadd.f32 %v497_v24, %v496_v7 }
  0x99   : > { %v432_v39 = vmul.f32 %v431_v35, %v417_v25  ;;  %v434_v19 = vmul.f32 %v431_v35, %v419_v26  ;;  %v436_v20 = vmul.f32 %v431_v35, %v422_v33  ;;  %v438_v27 = vmul.f32 %v431_v35, %v425_v37 }
  0x9a   : > { %v454_v34 = vsel %vm453_vm2, 1.0, %v1034_v51  ;;  %v477_v44 = vsel %vm476_vm3, 1.0, %v1034_v51  ;;  %vm499_vm4 = vcmp.gt.f32.partialorder %v498_v36, 0.0  ;;  %v520_v47 = vstv %s1399_s23 }
  0x9b   : > { %v433_v25 = vadd.f32 %v432_v39, %v413_v28  ;;  %v435_v49 = vadd.f32 %v434_v19, %v414_v30  ;;  %v437_v53 = vadd.f32 %v436_v20, %v415_v29  ;;  %v439_v26 = vadd.f32 %v438_v27, %v416_v32  ;;  %s324_s21 = scalar_lea.vmem %s1576_s19, %s1575_s3 }
  0x9c   : > { %v455_v33 = vmul.f32 %v454_v34, %v440_v40  ;;  %v457_v54 = vmul.f32 %v454_v34, %v442_v41  ;;  %v459_v37 = vmul.f32 %v454_v34, %v445_v50  ;;  %v461_v57 = vmul.f32 %v454_v34, %v448_v52 }
  0x9d   : > { %v478_v59 = vmul.f32 %v477_v44, %v463_v42  ;;  %v480_v17 = vmul.f32 %v477_v44, %v465_v43  ;;  %v482_v0 = vmul.f32 %v477_v44, %v468_v55  ;;  %v484_v1 = vmul.f32 %v477_v44, %v471_v6 }
  0x9e   : > { %v456_v4 = vadd.f32 %v455_v33, %v433_v25  ;;  %v458_v40 = vadd.f32 %v457_v54, %v435_v49  ;;  %v460_v5 = vadd.f32 %v459_v37, %v437_v53  ;;  %v462_v41 = vadd.f32 %v461_v57, %v439_v26 }
  0x9f   : > { %v500_v50 = vsel %vm499_vm4, 1.0, %v1034_v51  ;;  %v521_v52 = vadd.f32 %v520_v47, %v519_v18  ;;  %v543_v42 = vstv %s1411_s0  ;;  %v565_v7 = vadd.f32 %v564_v11, %v562_v15 }
  0xa0   : > { %v479_v8 = vadd.f32 %v478_v59, %v456_v4  ;;  %v481_v43 = vadd.f32 %v480_v17, %v458_v40  ;;  %v483_v3 = vadd.f32 %v482_v0, %v460_v5  ;;  %v485_v55 = vadd.f32 %v484_v1, %v462_v41  ;;  %v594_v1 = vld [vmem:[#allocation2] sm:$0x3] }
  0xa1   : > { %v501_v6 = vmul.f32 %v500_v50, %v486_v45  ;;  %v503_v12 = vmul.f32 %v500_v50, %v488_v46  ;;  %v505_v13 = vmul.f32 %v500_v50, %v491_v60  ;;  %v507_v22 = vmul.f32 %v500_v50, %v494_v9 }
  0xa2   : > { %vm522_vm5 = vcmp.gt.f32.partialorder %v521_v52, 0.0  ;;  %v544_v18 = vadd.f32 %v543_v42, %v542_v21  ;;  %v566_v63 = vstv %s1430_s2 }
  0xa3   : > { %v502_v11 = vadd.f32 %v501_v6, %v479_v8  ;;  %v504_v15 = vadd.f32 %v503_v12, %v481_v43  ;;  %v506_v24 = vadd.f32 %v505_v13, %v483_v3  ;;  %v508_v28 = vadd.f32 %v507_v22, %v485_v55 }
  0xa4   : > { %v523_v45 = vsel %vm522_vm5, 1.0, %v1034_v51  ;;  %vm545_vm6 = vcmp.gt.f32.partialorder %v544_v18, 0.0  ;;  %v567_v46 = vadd.f32 %v566_v63, %v565_v7 }
  0xa5   : > { %v524_v30 = vmul.f32 %v523_v45, %v509_v58  ;;  %v526_v60 = vmul.f32 %v523_v45, %v511_v62  ;;  %v528_v9 = vmul.f32 %v523_v45, %v514_v2  ;;  %v530_v21 = vmul.f32 %v523_v45, %v517_v16 }
  0xa6   : > { %v546_v29 = vsel %vm545_vm6, 1.0, %v1034_v51  ;;  %vm568_vm7 = vcmp.gt.f32.partialorder %v567_v46, 0.0 }
  0xa7   : > { %v525_v32 = vadd.f32 %v524_v30, %v502_v11  ;;  %v527_v35 = vadd.f32 %v526_v60, %v504_v15  ;;  %v529_v36 = vadd.f32 %v528_v9, %v506_v24  ;;  %v531_v39 = vadd.f32 %v530_v21, %v508_v28 }
  0xa8   : > { %v547_v19 = vmul.f32 %v546_v29, %v532_v10  ;;  %v549_v58 = vmul.f32 %v546_v29, %v534_v14  ;;  %v551_v62 = vmul.f32 %v546_v29, %v537_v23  ;;  %v553_v2 = vmul.f32 %v546_v29, %v540_v31 }
  0xa9   : > { %v569_v16 = vsel %vm568_vm7, 1.0, %v1034_v51 }
  0xaa   : > { %v548_v20 = vadd.f32 %v547_v19, %v525_v32  ;;  %v550_v27 = vadd.f32 %v549_v58, %v527_v35  ;;  %v552_v34 = vadd.f32 %v551_v62, %v529_v36  ;;  %v554_v44 = vadd.f32 %v553_v2, %v531_v39 }
  0xab   : > { %v570_v47 = vmul.f32 %v569_v16, %v555_v38  ;;  %v572_v25 = vmul.f32 %v569_v16, %v557_v48  ;;  %v574_v49 = vmul.f32 %v569_v16, %v560_v56  ;;  %v576_v10 = vmul.f32 %v569_v16, %v563_v61 }
  0xad   : > { %v571_v53 = vadd.f32 %v570_v47, %v548_v20  ;;  %v573_v14 = vadd.f32 %v572_v25, %v550_v27  ;;  %v575_v26 = vadd.f32 %v574_v49, %v552_v34  ;;  %v577_v23 = vadd.f32 %v576_v10, %v554_v44 }
  0xaf   : > { %v578_v33 = vmul.f32 %v571_v53, %v571_v53  ;;  %v579_v31 = vmul.f32 %v573_v14, %v573_v14  ;;  %v581_v54 = vmul.f32 %v575_v26, %v575_v26  ;;  %v583_v37 = vmul.f32 %v577_v23, %v577_v23 }
  0xb1   : > { %v580_v51 = vadd.f32 %v579_v31, %v578_v33 }
  0xb3   : > { %v582_v57 = vadd.f32 %v581_v54, %v580_v51 }
  0xb5   : > { %v584_v59 = vadd.f32 %v583_v37, %v582_v57 }
  0xb7   : > { %892 = vrsqrt.f32 %v584_v59  ;;  %vm587_vm8 = vcmp.eq.f32.partialorder %v584_v59, inf  ;;  %v590_v38 = vand.u32 2147483648, %v584_v59  ;;  %vm589_vm9 = vcmp.eq.f32.partialorder %v584_v59, 0.0 }
  0xc4   : > { %v893_v17 = vpop.eup %892 }
  0xc5   : > { %v586_v48 = vmul.f32 %v893_v17, %v584_v59 }
  0xc7   : > { %v588_v56 = vsel %vm587_vm8, %v584_v59, %v586_v48 }
  0xc8   : > { %v591_v0 = vsel %vm589_vm9, %v590_v38, %v588_v56 }
  0xc9   : > { %v795_v61 = vadd.f32 -1.0, %v591_v0 }
  0xcb   : > { %v593_v4 = vmul.f32 %v795_v61, %v795_v61 }
  0xcd   : > { %v595_v40 = vadd.f32 %v594_v1, %v593_v4 }
  0xcf   : > { %596 = vst [vmem:[#allocation2] sm:$0x3] %v595_v40 }
  0xd6   : > { %v600_v5 = vld [vmem:[#allocation2] sm:$0xff] }
  0xd7   : > { %601 = vadd.xlane.f32.xlu0 %v600_v5 }
 0x160   : > { %v602_v41 = vpop.xlane.xlu0 %601 }
 0x161   : > { %v603_v50 = vrot.slane %v602_v41, 4 }
 0x163   : > { %v604_v52 = vadd.f32 %v603_v50, %v602_v41 }
 0x165   : > { %v605_v42 = vrot.slane %v604_v52, 2 }
 0x167   : > { %v606_v7 = vadd.f32 %v605_v42, %v604_v52 }
 0x169   : > { %v607_v8 = vrot.slane %v606_v7, 1 }
 0x16b   : > { %v608_v43 = vadd.f32 %v607_v8, %v606_v7 }
 0x16d   : > { %800 = vpush %v608_v43 }
 0x19e   : > { %s801_s17 = spop %800 }
 0x19f   : > { %v610_v3 = vstv %s801_s17 }
 0x1a0   : > { %612 = vst.msk [vmem:[%s324_s21] sm:$0x1] %vm611_vm10, %v610_v3 }
 0x1a1 PF: > { %s1577_s13 = sld [smem:[#allocation18_spill]] }
 0x1a2   : > { %s1578_s18 = sld [smem:[#allocation15_spill]] }
 0x1a3   : > { %s1579_s19 = sld [smem:[#allocation16_spill]] }
 0x1a4   : > { %s1580_s20 = sld [smem:[#allocation20_spill]] }
 0x1a5   : > { %s1581_s21 = sld [smem:[#allocation17_spill]] }
 0x1a6   : > { %s1582_s22 = sld [smem:[#allocation19_spill]] }
 0x1a7   : > { %s21_s23 = sadd.s32 1, %s1577_s13  }
 0x1a8   : > { %p18_p12 = scmp.ge.s32.totalorder %s21_s23, 4  }
 0x1aa   :  { %20 = sbr.rel (!%p18_p12) target bundleno = 14 (0xe), region = 111 }
 0x1af   :  { %630 = vsyncpa [#allocation4], 1 }
 0x1b0   :  { %632 = vsyncpa [#allocation4 + $0x1], 1 }
 0x1b1   :  { %633 = vsyncpa [#allocation5], 1 }
 0x1b2   :  { %635 = vsyncpa [#allocation5 + $0x1], 1 }
 0x1b3   :  { %636 = vsyncpa [#allocation6], 1 }
 0x1b4   :  { %638 = vsyncpa [#allocation6 + $0x1], 1 }
 0x1b5   :  { %639 = vsyncpa [#allocation8], 1 }

</bundles_post_ra>
